<compile_context>
chip_gen: v7x
topology: tpu7x:2x2x1
jax: 0.10.0
libtpu: 0.0.40
codegen_flags: <defaults>
</compile_context>

<pallas_src>
import functools

import jax
import jax.numpy as jnp
from jax.experimental import pallas as pl
from jax.experimental.pallas import tpu as pltpu

BN_EPS = 1e-5


def feature_block_kernel(x_ref, w_ref, gamma_ref, beta_ref, o_ref, acc_ref):
    # Grid: (n, k) = (Dlow tile [parallel], Din tile [reduction, last]).
    # x_ref:     (B,  tk)
    # w_ref:     (tk, tn)
    # gamma_ref: (1,  tn)
    # beta_ref:  (1,  tn)
    # o_ref:     (B,  tn)   written only on the last k step
    # acc_ref:   (B,  tn)   f32 accumulator, resident across the k axis
    k = pl.program_id(1)

    @pl.when(k == 0)
    def _():
        acc_ref[...] = jnp.zeros_like(acc_ref)

    # MXU matmul, f32 accumulation regardless of input dtype.
    acc_ref[...] += jnp.dot(
        x_ref[...], w_ref[...], preferred_element_type=jnp.float32
    )

    @pl.when(k == pl.num_programs(1) - 1)
    def _():
        y = acc_ref[...]                                            # (B, tn) f32
        # Batch statistics per feature (biased variance, like BatchNorm1d).
        mean = jnp.mean(y, axis=0, keepdims=True)                   # (1, tn)
        centered = y - mean
        var = jnp.mean(centered * centered, axis=0, keepdims=True)  # (1, tn)
        # Fold BN into a single per-feature scale/shift (rsqrt -> EUP slot).
        scale = gamma_ref[...] * jax.lax.rsqrt(var + BN_EPS)        # (1, tn)
        shift = beta_ref[...] - mean * scale                        # (1, tn)
        o_ref[...] = (y * scale + shift).astype(o_ref.dtype)


def _round_up(a, m):
    return (a + m - 1) // m * m


@functools.partial(jax.jit, static_argnames=("tile_n", "tile_k", "matmul_dtype"))
def feature_block(x, w, gamma, beta, *, tile_n=128, tile_k=512,
                  matmul_dtype=jnp.float32):
    """FeatureBlock forward.

    x: (B, Din) f32; w: (Din, Dlow) f32 (transpose of PyTorch's (Dlow, Din));
    gamma/beta: (Dlow,) f32.  Returns (B, Dlow) f32.

    The Linear bias is intentionally absent: it is exactly cancelled by the
    BatchNorm mean subtraction, so the forward output is unchanged.
    `matmul_dtype=jnp.bfloat16` enables bf16 MXU inputs (f32 accumulation,
    f32 BN math) for v6e/v7x when the precision budget allows it.
    """
    B, Din = x.shape
    Dlow = w.shape[1]

    # Lane-dense padding: K and N up to multiples of 128 (and of the tile).
    tk = min(tile_k, _round_up(Din, 128))
    tn = min(tile_n, _round_up(Dlow, 128))
    Kp = _round_up(Din, tk)
    Np = _round_up(Dlow, tn)

    xp = jnp.pad(x, ((0, 0), (0, Kp - Din)))
    wp = jnp.pad(w, ((0, Kp - Din), (0, Np - Dlow)))
    gp = jnp.pad(gamma, (0, Np - Dlow)).reshape(1, Np)
    bp = jnp.pad(beta, (0, Np - Dlow)).reshape(1, Np)

    if matmul_dtype != xp.dtype:
        xp = xp.astype(matmul_dtype)
        wp = wp.astype(matmul_dtype)

    grid = (Np // tn, Kp // tk)  # (Dlow tiles [parallel], Din tiles [reduction])

    out_padded = pl.pallas_call(
        feature_block_kernel,
        out_shape=jax.ShapeDtypeStruct((B, Np), jnp.float32),
        grid_spec=pltpu.PrefetchScalarGridSpec(
            num_scalar_prefetch=0,
            grid=grid,
            in_specs=[
                pl.BlockSpec((B, tk), lambda n, k: (0, k)),   # x
                pl.BlockSpec((tk, tn), lambda n, k: (k, n)),  # w
                pl.BlockSpec((1, tn), lambda n, k: (0, n)),   # gamma
                pl.BlockSpec((1, tn), lambda n, k: (0, n)),   # beta
            ],
            out_specs=pl.BlockSpec((B, tn), lambda n, k: (0, n)),
            scratch_shapes=[pltpu.VMEM((B, tn), jnp.float32)],
        ),
        compiler_params=pltpu.CompilerParams(
            dimension_semantics=("parallel", "arbitrary"),
            vmem_limit_bytes=32 * 1024 * 1024,  # safe on v5e/v6e/v7x defaults
        ),
    )(xp, wp, gp, bp)

    return out_padded[:, :Dlow]


def init_params(key, input_dim, low_dim):
    """Deterministic init matching weights_init_kaiming for Linear + BatchNorm1d."""
    k_w, k_g = jax.random.split(key)
    # Linear: kaiming_normal_(a=0, mode='fan_out') -> std = sqrt(2 / fan_out).
    # PyTorch weight is (low_dim, input_dim); fan_out = low_dim.
    std = (2.0 / low_dim) ** 0.5
    w_pt = jax.random.normal(k_w, (low_dim, input_dim), dtype=jnp.float32) * std
    w = w_pt.T  # (input_dim, low_dim) for x @ w
    b = jnp.zeros((low_dim,), dtype=jnp.float32)  # Linear bias (cancels under BN)
    # BatchNorm1d: weight ~ N(1.0, 0.01), bias = 0
    gamma = 1.0 + 0.01 * jax.random.normal(k_g, (low_dim,), dtype=jnp.float32)
    beta = jnp.zeros((low_dim,), dtype=jnp.float32)
    return w, b, gamma, beta


if __name__ == "__main__":
    key = jax.random.PRNGKey(0)
    k_x, k_p = jax.random.split(key)

    B, input_dim, low_dim = 8, 32, 16
    x = jax.random.normal(k_x, (B, input_dim), dtype=jnp.float32)
    w, b, gamma, beta = init_params(k_p, input_dim, low_dim)

    out = feature_block(x, w, gamma, beta)
    out = jax.block_until_ready(out)

    # Reference check in plain JAX (full module math, including the Linear
    # bias — it cancels through BN, so results must match).
    y_ref = x @ w + b
    mu = y_ref.mean(axis=0, keepdims=True)
    var = ((y_ref - mu) ** 2).mean(axis=0, keepdims=True)
    ref = gamma * (y_ref - mu) / jnp.sqrt(var + BN_EPS) + beta

    assert out.shape == (B, low_dim)
    assert jnp.allclose(out, ref, atol=1e-4, rtol=1e-4)

    print("KERNEL_OK")
</pallas_src>

<mosaic_0001>
module attributes {stable_mosaic.version = 11 : i64} {
  func.func @feature_block_kernel(%arg0: i32, %arg1: i32, %arg2: memref<8x128xf32, #tpu.memory_space<vmem>>, %arg3: memref<128x128xf32, #tpu.memory_space<vmem>>, %arg4: memref<1x128xf32, #tpu.memory_space<vmem>>, %arg5: memref<1x128xf32, #tpu.memory_space<vmem>>, %arg6: memref<8x128xf32, #tpu.memory_space<vmem>>, %arg7: memref<8x128xf32, #tpu.memory_space<vmem>>) attributes {dimension_semantics = [#tpu.dimension_semantics<parallel>, #tpu.dimension_semantics<arbitrary>], iteration_bounds = array<i64: 1, 1>, scalar_prefetch = 0 : i64, scratch_operands = 1 : i64, tpu.core_type = #tpu.core_type<tc>, window_params = [{transform_indices = @transform_0, window_bounds = array<i64: 8, 128>}, {transform_indices = @transform_1, window_bounds = array<i64: 128, 128>}, {transform_indices = @transform_2, window_bounds = array<i64: 1, 128>}, {transform_indices = @transform_3, window_bounds = array<i64: 1, 128>}, {transform_indices = @transform_4, window_bounds = array<i64: 8, 128>}]} {
    %c0_i32 = arith.constant 0 : i32
    %0 = arith.cmpi eq, %arg1, %c0_i32 : i32
    %1 = arith.extui %0 : i1 to i32
    %c0_i32_0 = arith.constant 0 : i32
    %2 = arith.cmpi ne, %1, %c0_i32_0 : i32
    scf.if %2 {
      %cst_10 = arith.constant 0.000000e+00 : f32
      %12 = vector.broadcast %cst_10 : f32 to vector<8x128xf32>
      %c0_11 = arith.constant 0 : index
      %c0_12 = arith.constant 0 : index
      %13 = vector.load %arg7[%c0_11, %c0_12] : memref<8x128xf32, #tpu.memory_space<vmem>>, vector<8x128xf32>
      tpu.vector_store %arg7[%c0_11, %c0_12], %12 {strides = array<i32>} : memref<8x128xf32, #tpu.memory_space<vmem>>, vector<8x128xf32>,
    } else {
    }
    %c0 = arith.constant 0 : index
    %c0_1 = arith.constant 0 : index
    %3 = vector.load %arg7[%c0, %c0_1] : memref<8x128xf32, #tpu.memory_space<vmem>>, vector<8x128xf32>
    %c0_2 = arith.constant 0 : index
    %c0_3 = arith.constant 0 : index
    %4 = vector.load %arg2[%c0_2, %c0_3] : memref<8x128xf32, #tpu.memory_space<vmem>>, vector<8x128xf32>
    %c0_4 = arith.constant 0 : index
    %c0_5 = arith.constant 0 : index
    %5 = vector.load %arg3[%c0_4, %c0_5] : memref<128x128xf32, #tpu.memory_space<vmem>>, vector<128x128xf32>
    %cst = arith.constant dense<0.000000e+00> : vector<8x128xf32>
    %6 = tpu.matmul %4, %5, %cst {dimension_numbers = #tpu.dot_dimension_numbers<[1], [0], [0], [1], [0, 0, 1, 1], [], []>} : vector<8x128xf32>, vector<128x128xf32>, vector<8x128xf32> -> vector<8x128xf32>
    %7 = arith.addf %3, %6 : vector<8x128xf32>
    %c0_6 = arith.constant 0 : index
    %c0_7 = arith.constant 0 : index
    %8 = vector.load %arg7[%c0_6, %c0_7] : memref<8x128xf32, #tpu.memory_space<vmem>>, vector<8x128xf32>
    tpu.vector_store %arg7[%c0_6, %c0_7], %7 {strides = array<i32>} : memref<8x128xf32, #tpu.memory_space<vmem>>, vector<8x128xf32>,
    %c0_i32_8 = arith.constant 0 : i32
    %9 = arith.cmpi eq, %arg1, %c0_i32_8 : i32
    %10 = arith.extui %9 : i1 to i32
    %c0_i32_9 = arith.constant 0 : i32
    %11 = arith.cmpi ne, %10, %c0_i32_9 : i32
    scf.if %11 {
      %c0_10 = arith.constant 0 : index
      %c0_11 = arith.constant 0 : index
      %12 = vector.load %arg7[%c0_10, %c0_11] : memref<8x128xf32, #tpu.memory_space<vmem>>, vector<8x128xf32>
      %cst_12 = arith.constant dense<0.000000e+00> : vector<128xf32>
      %13 = vector.multi_reduction <add>, %12, %cst_12 [0] : vector<8x128xf32> to vector<128xf32>
      %14 = vector.shape_cast %13 : vector<128xf32> to vector<1x128xf32>
      %cst_13 = arith.constant 8.000000e+00 : f32
      %15 = vector.broadcast %cst_13 : f32 to vector<1x128xf32>
      %16 = arith.divf %14, %15 : vector<1x128xf32>
      %17 = vector.broadcast %16 : vector<1x128xf32> to vector<8x128xf32>
      %18 = arith.subf %12, %17 : vector<8x128xf32>
      %19 = arith.mulf %18, %18 : vector<8x128xf32>
      %cst_14 = arith.constant dense<0.000000e+00> : vector<128xf32>
      %20 = vector.multi_reduction <add>, %19, %cst_14 [0] : vector<8x128xf32> to vector<128xf32>
      %21 = vector.shape_cast %20 : vector<128xf32> to vector<1x128xf32>
      %cst_15 = arith.constant 8.000000e+00 : f32
      %22 = vector.broadcast %cst_15 : f32 to vector<1x128xf32>
      %23 = arith.divf %21, %22 : vector<1x128xf32>
      %c0_16 = arith.constant 0 : index
      %c0_17 = arith.constant 0 : index
      %24 = vector.load %arg4[%c0_16, %c0_17] : memref<1x128xf32, #tpu.memory_space<vmem>>, vector<1x128xf32>
      %cst_18 = arith.constant 9.99999974E-6 : f32
      %25 = vector.broadcast %cst_18 : f32 to vector<1x128xf32>
      %26 = arith.addf %23, %25 : vector<1x128xf32>
      %27 = math.rsqrt %26 : vector<1x128xf32>
      %28 = arith.mulf %24, %27 : vector<1x128xf32>
      %c0_19 = arith.constant 0 : index
      %c0_20 = arith.constant 0 : index
      %29 = vector.load %arg5[%c0_19, %c0_20] : memref<1x128xf32, #tpu.memory_space<vmem>>, vector<1x128xf32>
      %30 = arith.mulf %16, %28 : vector<1x128xf32>
      %31 = arith.subf %29, %30 : vector<1x128xf32>
      %32 = vector.broadcast %28 : vector<1x128xf32> to vector<8x128xf32>
      %33 = arith.mulf %12, %32 : vector<8x128xf32>
      %34 = vector.broadcast %31 : vector<1x128xf32> to vector<8x128xf32>
      %35 = arith.addf %33, %34 : vector<8x128xf32>
      %c0_21 = arith.constant 0 : index
      %c0_22 = arith.constant 0 : index
      %36 = vector.load %arg6[%c0_21, %c0_22] : memref<8x128xf32, #tpu.memory_space<vmem>>, vector<8x128xf32>
      tpu.vector_store %arg6[%c0_21, %c0_22], %35 {strides = array<i32>} : memref<8x128xf32, #tpu.memory_space<vmem>>, vector<8x128xf32>,
    } else {
    }
    return
  }
  func.func @transform_0(%arg0: i32, %arg1: i32) -> (i32, i32) {
    %c0_i32 = arith.constant 0 : i32
    %c0_i32_0 = arith.constant 0 : i32
    return %c0_i32, %arg1 : i32, i32
  }
  func.func @transform_1(%arg0: i32, %arg1: i32) -> (i32, i32) {
    %c0_i32 = arith.constant 0 : i32
    return %arg1, %arg0 : i32, i32
  }
  func.func @transform_2(%arg0: i32, %arg1: i32) -> (i32, i32) {
    %c0_i32 = arith.constant 0 : i32
    %c0_i32_0 = arith.constant 0 : i32
    return %c0_i32, %arg0 : i32, i32
  }
  func.func @transform_3(%arg0: i32, %arg1: i32) -> (i32, i32) {
    %c0_i32 = arith.constant 0 : i32
    %c0_i32_0 = arith.constant 0 : i32
    return %c0_i32, %arg0 : i32, i32
  }
  func.func @transform_4(%arg0: i32, %arg1: i32) -> (i32, i32) {
    %c0_i32 = arith.constant 0 : i32
    %c0_i32_0 = arith.constant 0 : i32
    return %c0_i32, %arg0 : i32, i32
  }
}

</mosaic_0001>

<bundles_post_ra>
// kernel: feature_block.1
= control target key start
LH: loop header
LB: loop body
LE: loop exit
PB: predicated region body
PF: predicated region fallthrough
CT: control target
= control target key end

     0   :  { %v276_v3 = vmov 0.0|0.0   ;;  %vm277_vm0 = vmmov 0   ;;  %v278_v6 = vmov 0.0   ;;  %s374_s0 = inlined_call_operand.vmem [shape: f32[8,128], index: 0, kind: input, shape index: {}]   ;;  %s375_s1 = inlined_call_operand.vmem [shape: f32[128,128], index: 1, kind: input, shape index: {}]   ;;  %s376_s2 = inlined_call_operand.vmem [shape: f32[1,128], index: 2, kind: input, shape index: {}]   ;;  %s377_s3 = inlined_call_operand.vmem [shape: f32[1,128], index: 3, kind: input, shape index: {}]   ;;  %s378_s4 = inlined_call_operand.hbm [shape: f32[8,128], index: 4, kind: output, shape index: {}]  }
   0x1   :  { %v25_v0 = vld [vmem:[%s375_s1] sm:$0xff]  ;;  %v26_v1 = vld [vmem:[%s375_s1 + $0x8] sm:$0xff]  ;;  %v27_v2 = vld [vmem:[%s375_s1 + $0x10] sm:$0xff]  ;;  %222 = vmatprep.subr.bf16.mxu0 %v276_v3  ;;  %219 = vmatprep.mubr.msk.f32.mxu0 %vm277_vm0, %v278_v6 }
   0x2   :  { %v223_v4 = vpack.c.bf16 %v26_v1, %v25_v0  ;;  %v28_v5 = vld [vmem:[%s375_s1 + $0x18] sm:$0xff]  ;;  %v29_v8 = vld [vmem:[%s375_s1 + $0x20] sm:$0xff]  ;;  %v30_v9 = vld [vmem:[%s375_s1 + $0x28] sm:$0xff] }
   0x3   :  { %v226_v7 = vpack.c.bf16 %v28_v5, %v27_v2 }
   0x4   :  { %224 = vmatpush3.bf16.msra.mxu0 %v223_v4 }
   0x5   :  { %225 = vmatprep.subr.bf16.mxu0 %v276_v3 }
   0x6   :  { %9 = vsyncpa [#allocation4], 0  ;;  %v229_v10 = vpack.c.bf16 %v30_v9, %v29_v8  ;;  %v31_v11 = vld [vmem:[%s375_s1 + $0x30] sm:$0xff]  ;;  %v32_v12 = vld [vmem:[%s375_s1 + $0x38] sm:$0xff]  ;;  %v142_v46 = vlaneseq  ;;  %s279_s25 = smov [#allocation3]  }
   0x7   :  { %v232_v13 = vpack.c.bf16 %v32_v12, %v31_v11  ;;  %v33_v14 = vld [vmem:[%s375_s1 + $0x40] sm:$0xff]  ;;  %v34_v15 = vld [vmem:[%s375_s1 + $0x48] sm:$0xff]  ;;  %v35_v17 = vld [vmem:[%s375_s1 + $0x50] sm:$0xff]  ;;  %s162_s26 = sshll.u32 %s279_s25, 4  ;;  %s163_s26 = int_to_ptr.vmem [resolvable:$true] %s162_s26 }
   0x8   :  { %227 = vmatpush3.bf16.msra.mxu0 %v226_v7  ;;  %v235_v16 = vpack.c.bf16 %v34_v15, %v33_v14  ;;  %v36_v18 = vld [vmem:[%s375_s1 + $0x58] sm:$0xff]  ;;  %v37_v20 = vld [vmem:[%s375_s1 + $0x60] sm:$0xff]  ;;  %v38_v21 = vld [vmem:[%s375_s1 + $0x68] sm:$0xff]  ;;  %v143_v47 = vshrl.u32 %v142_v46, 7  ;;  %s252_s27 = scalar_lea.vmem %s163_s26, 128  ;;  %p257_p1 = scmp.lt.s32.totalorder %s163_s26, %s163_s26 }
   0x9   :  { %228 = vmatprep.subr.bf16.mxu0 %v276_v3  ;;  %v238_v19 = vpack.c.bf16 %v36_v18, %v35_v17  ;;  %v241_v22 = vpack.c.bf16 %v38_v21, %v37_v20  ;;  %v39_v23 = vld [vmem:[%s375_s1 + $0x70] sm:$0xff]  ;;  %v40_v24 = vld [vmem:[%s375_s1 + $0x78] sm:$0xff]  ;;  %v24_v26 = vld [vmem:[%s374_s0] sm:$0xff]  ;;  %p253_p0 = scmp.ne.s32.totalorder %s163_s26, %s252_s27  ;;  %p258_p2 = scmp.lt.s32.totalorder %s252_s27, %s252_s27 }
   0xa   :  { %v244_v25 = vpack.c.bf16 %v40_v24, %v39_v23  ;;  %v134_v48 = vld [vmem:[%s376_s2] sm:$0x1]  ;;  %v144_v49 = vsub.s32 0, %v143_v47 }
   0xb   :  { %v138_v52 = vld [vmem:[%s377_s3] sm:$0x1]  ;;  %p259_p3 = por %p258_p2, %p257_p1 }
   0xc   :  { %230 = vmatpush3.bf16.msra.mxu0 %v229_v10 }
   0xd   :  { %231 = vmatprep.subr.bf16.mxu0 %v276_v3  ;;  %p260_p4 = pnand %p259_p3, %p253_p0 }
  0x10   :  { %233 = vmatpush3.bf16.msra.mxu0 %v232_v13 }
  0x11   :  { %234 = vmatprep.subr.bf16.mxu0 %v276_v3 }
  0x14   :  { %236 = vmatpush3.bf16.msra.mxu0 %v235_v16 }
  0x15   :  { %237 = vmatprep.subr.bf16.mxu0 %v276_v3 }
  0x18   :  { %239 = vmatpush3.bf16.msra.mxu0 %v238_v19 }
  0x19   :  { %240 = vmatprep.subr.bf16.mxu0 %v276_v3 }
  0x1c   :  { %242 = vmatpush3.bf16.msra.mxu0 %v241_v22 }
  0x1d   :  { %243 = vmatprep.subr.bf16.mxu0 %v276_v3 }
  0x20   :  { %245 = vmatpush3.bf16.msra.mxu0 %v244_v25 }
  0x23   :  { %220 = vmatmul.mubr.f32.vlgmr.msra.gmra.mrb[0].mxu0 %v24_v26 }
  0xf6   :  { %v107_v27 = vpop.f32.mrb[0].mxu0 }
  0xf7   :  { %v117_v28 = vrot.slane %v107_v27, 4  ;;  %v221_v29 = vpop.f32.mrb[1].mxu0 }
  0xf9   :  { %v118_v30 = vadd.f32 %v117_v28, %v107_v27 }
  0xfb   :  { %v119_v31 = vrot.slane %v118_v30, 2 }
  0xfd   :  { %v120_v32 = vadd.f32 %v119_v31, %v118_v30 }
  0xff   :  { %v121_v33 = vrot.slane %v120_v32, 1 }
 0x101   :  { %v122_v34 = vadd.f32 %v121_v33, %v120_v32 }
 0x103   :  { %v124_v35 = vmul.f32 0.125, %v122_v34 }
 0x105   :  { %v125_v36 = vsub.f32 %v107_v27, %v124_v35 }
 0x107   :  { %v126_v37 = vmul.f32 %v125_v36, %v125_v36 }
 0x109   :  { %v127_v38 = vrot.slane %v126_v37, 4 }
 0x10b   :  { %v128_v39 = vadd.f32 %v127_v38, %v126_v37 }
 0x10d   :  { %v129_v40 = vrot.slane %v128_v39, 2 }
 0x10f   :  { %v130_v41 = vadd.f32 %v129_v40, %v128_v39 }
 0x111   :  { %v131_v42 = vrot.slane %v130_v41, 1 }
 0x113   :  { %v132_v43 = vadd.f32 %v131_v42, %v130_v41 }
 0x115   :  { %v133_v44 = vmul.f32 0.125, %v132_v43 }
 0x117   :  { %v135_v45 = vadd.f32 1e-05, %v133_v44 }
 0x119   :  { %250 = vrsqrt.f32 %v135_v45 }
 0x123   :  { %v251_v50 = vpop.eup %250 }
 0x124   :  { %v137_v51 = vmul.f32 %v251_v50, %v134_v48 }
 0x126   :  { %v139_v53 = vmul.f32 %v137_v51, %v124_v35  ;;  %v145_v54 = vrot.slane %v137_v51, %v144_v49 }
 0x128   :  { %v140_v55 = vsub.f32 %v138_v52, %v139_v53  ;;  %v147_v56 = vmul.f32 %v145_v54, %v107_v27 }
 0x12a   :  { %v152_v57 = vrot.slane %v140_v55, %v144_v49 }
 0x12c   :  { %v154_v58 = vadd.f32 %v152_v57, %v147_v56 }
 0x12e   :  { %155 = vst [vmem:[#allocation3] sm:$0xff] %v154_v58 }
 0x12f   :  { %263 = shalt.err (!%p260_p4)
}
 0x130   :  { %s264_s3 = scalar_lea.hbm %s378_s4, 128 }
 0x131   :  { %p265_p5 = scmp.ne.s32.totalorder %s378_s4, %s264_s3  ;;  %p268_p6 = scmp.lt.u32.totalorder %s264_s3, %s378_s4 }
 0x133   :  { %p270_p7 = pnand %p268_p6, %p265_p5 }
 0x135   :  { %273 = shalt.err (!%p270_p7)
}
 0x136   :  { %165 = dma.vmem_to_hbm [thread:$0]  %s163_s26, 128, %s378_s4, [#allocation4]  }
 0x137   :  { %274 = dma.done.wait [#allocation4], 128  }
 0x138   :  { %275 = vsyncadd [#allocation4], 4294967168 }
 0x139   :  { %169 = vsyncpa [#allocation4], 1 }

</bundles_post_ra>
